<compile_context>
chip_gen: v5e
topology: v5e:2x2
jax: 0.10.0
libtpu: 0.0.40
codegen_flags: <defaults>
</compile_context>

<pallas_src>
import math

import jax
import jax.numpy as jnp
from jax.experimental import pallas as pl
from jax.experimental.pallas import tpu as pltpu


def state_transfer(query_in, key_in, value_in, params, d_k):
    """StateTransfer forward.

    query_in: (B, Lq, embed_dim); key_in: (B, Lk, embed_dim);
    value_in: (B, Lk, 1) -- unused (return_attention=True, is_value_embed=False).
    params = (wq, bq, wk, bk), weights pre-transposed to (d_in, d_out).
    Returns attention weights (B, Lq, Lk), softmax-normalized over dim=1.
    """
    del value_in  # unused by the module in this configuration
    B, Lq, Dq = query_in.shape
    _, Lk, Dk = key_in.shape
    assert Dq == Dk, "query/key embed dims must match"
    wq, bq, wk, bk = params
    d_ker = wq.shape[1]
    inv_sqrt_dk = 1.0 / math.sqrt(d_k)

    nq = B * Lq
    nk = B * Lk
    # NOTE: Lq/Lk are multiples of 8 here, so all static row slices below land on
    # (8,128) sublane tile boundaries (no hidden relayout copies).

    # Pack six tiny inputs into three DMAs (descriptor/launch latency dominates
    # at these shapes, not bandwidth).
    x_pack = jnp.concatenate(
        [query_in.reshape(nq, Dq), key_in.reshape(nk, Dk)], axis=0)     # (nq+nk, D)
    w_pack = jnp.concatenate([wq, wk], axis=1)                          # (D, 2*d_ker)
    b_pack = jnp.concatenate([bq, bk], axis=1)                          # (1, 2*d_ker)

    def kernel(x_ref, w_ref, b_ref, out_ref):
        # Single projection matmul for all batches' q and k, f32 end-to-end.
        proj = jnp.dot(x_ref[...], w_ref[...],
                       preferred_element_type=jnp.float32) + b_ref[...]  # (nq+nk, 2*d_ker)
        q_all = proj[:nq, :d_ker]                       # (B*Lq, d_ker)
        k_all = proj[nq:nq + nk, d_ker:2 * d_ker]       # (B*Lk, d_ker)

        # Single QK^T for all batches (contract last dims; no transpose materialized).
        logits_full = jax.lax.dot_general(
            q_all, k_all, (((1,), (1,)), ((), ())),
            preferred_element_type=jnp.float32)          # (B*Lq, B*Lk)

        # Row correction -0.5*||q_i||^2 (varies along the softmax axis -> kept).
        q_sq_half = 0.5 * jnp.sum(q_all * q_all, axis=1, keepdims=True)  # (B*Lq, 1)

        # B is tiny and static -> unrolled Python loop over the diagonal blocks.
        for b in range(B):
            logits = logits_full[b * Lq:(b + 1) * Lq, b * Lk:(b + 1) * Lk]  # (Lq, Lk)
            logits = (logits - q_sq_half[b * Lq:(b + 1) * Lq, :]) * inv_sqrt_dk
            # NOTE: the module's -0.5*||k_j||^2 column correction is constant along
            # dim=1 (the softmax axis here) and cancels exactly in the softmax, so
            # it is intentionally skipped (the f32 reference retains it; outputs match).

            # softmax over dim=1 (the query axis) == axis 0 of this 2-D tile.
            m = jnp.max(logits, axis=0, keepdims=True)
            e = jnp.exp(logits - m)
            denom = jnp.sum(e, axis=0, keepdims=True)
            out_ref[b * Lq:(b + 1) * Lq, :] = (e / denom).astype(out_ref.dtype)

    # Entire problem is a few KiB: no grid, whole arrays resident in VMEM.
    out2 = pl.pallas_call(
        kernel,
        out_shape=jax.ShapeDtypeStruct((nq, Lk), jnp.float32),
        in_specs=[pl.BlockSpec(memory_space=pltpu.MemorySpace.VMEM) for _ in range(3)],
        out_specs=pl.BlockSpec(memory_space=pltpu.MemorySpace.VMEM),
    )(x_pack, w_pack, b_pack)
    return out2.reshape(B, Lq, Lk)


def _init_linear(key, d_in, d_out):
    """Deterministic nn.Linear-style init; weight returned pre-transposed (d_in, d_out)."""
    kw, kb = jax.random.split(key)
    bound = 1.0 / math.sqrt(d_in)
    w = jax.random.uniform(kw, (d_in, d_out), jnp.float32, -bound, bound)
    b = jax.random.uniform(kb, (1, d_out), jnp.float32, -bound, bound)
    return w, b


def _reference(query_in, key_in, params, d_k):
    """Pure-JAX f32 reference replicating the PyTorch StateTransfer forward exactly."""
    wq, bq, wk, bk = params
    q = query_in @ wq + bq
    k = key_in @ wk + bk
    logits = jnp.einsum("bqd,bkd->bqk", q, k)
    logits = logits - 0.5 * jnp.sum(q * q, axis=2, keepdims=True)
    logits = logits - 0.5 * jnp.transpose(jnp.sum(k * k, axis=2, keepdims=True), (0, 2, 1))
    logits = logits / math.sqrt(d_k)
    return jax.nn.softmax(logits, axis=1)   # is_state_transfer=True -> softmax over dim=1


if __name__ == "__main__":
    # Small shapes consistent with the module: batch=2, seq=8, embed_dim=d_ker=32.
    B, Lq, Lk = 2, 8, 8
    embed_dim, d_ker = 32, 32

    root = jax.random.PRNGKey(0)
    kp1, kp2, kq, kk, kv = jax.random.split(root, 5)

    query_in = jax.random.normal(kq, (B, Lq, embed_dim), jnp.float32)
    key_in = jax.random.normal(kk, (B, Lk, embed_dim), jnp.float32)
    value_in = jax.random.normal(kv, (B, Lk, 1), jnp.float32)   # d_v=1; unused by forward

    wq, bq = _init_linear(kp1, embed_dim, d_ker)
    wk, bk = _init_linear(kp2, embed_dim, d_ker)
    params = (wq, bq, wk, bk)

    out = state_transfer(query_in, key_in, value_in, params, d_k=embed_dim)
    out = jax.block_until_ready(out)

    ref = _reference(query_in, key_in, params, d_k=embed_dim)
    assert out.shape == (B, Lq, Lk)
    # f32 end-to-end kernel; small slack for MXU accumulation-order / dropped
    # (mathematically cancelling) k-norm term rounding differences.
    assert jnp.allclose(out, ref, atol=5e-3, rtol=5e-3), "mismatch vs JAX reference"
    # sanity: softmax over dim=1 means each (batch, key) column sums to 1.
    col_sums = jnp.sum(out, axis=1)
    assert jnp.allclose(col_sums, jnp.ones_like(col_sums), atol=1e-4)

    print("KERNEL_OK")
</pallas_src>

<mosaic_0001>
module attributes {stable_mosaic.version = 11 : i64} {
  func.func @kernel(%arg0: memref<32x32xf32, #tpu.memory_space<vmem>>, %arg1: memref<32x64xf32, #tpu.memory_space<vmem>>, %arg2: memref<1x64xf32, #tpu.memory_space<vmem>>, %arg3: memref<16x8xf32, #tpu.memory_space<vmem>>) attributes {dimension_semantics = [], scalar_prefetch = 0 : i64, scratch_operands = 0 : i64, tpu.core_type = #tpu.core_type<tc>} {
    %c0 = arith.constant 0 : index
    %c0_0 = arith.constant 0 : index
    %0 = vector.load %arg0[%c0, %c0_0] : memref<32x32xf32, #tpu.memory_space<vmem>>, vector<32x32xf32>
    %c0_1 = arith.constant 0 : index
    %c0_2 = arith.constant 0 : index
    %1 = vector.load %arg1[%c0_1, %c0_2] : memref<32x64xf32, #tpu.memory_space<vmem>>, vector<32x64xf32>
    %cst = arith.constant dense<0.000000e+00> : vector<32x64xf32>
    %2 = tpu.matmul %0, %1, %cst {dimension_numbers = #tpu.dot_dimension_numbers<[1], [0], [0], [1], [0, 0, 1, 1], [], []>} : vector<32x32xf32>, vector<32x64xf32>, vector<32x64xf32> -> vector<32x64xf32>
    %c0_3 = arith.constant 0 : index
    %c0_4 = arith.constant 0 : index
    %3 = vector.load %arg2[%c0_3, %c0_4] : memref<1x64xf32, #tpu.memory_space<vmem>>, vector<1x64xf32>
    %4 = vector.broadcast %3 : vector<1x64xf32> to vector<32x64xf32>
    %5 = arith.addf %2, %4 : vector<32x64xf32>
    %6 = vector.extract_strided_slice %5 {offsets = [0, 0], sizes = [16, 32], strides = [1, 1]} : vector<32x64xf32> to vector<16x32xf32>
    %7 = vector.extract_strided_slice %5 {offsets = [16, 32], sizes = [16, 32], strides = [1, 1]} : vector<32x64xf32> to vector<16x32xf32>
    %cst_5 = arith.constant dense<0.000000e+00> : vector<16x16xf32>
    %8 = tpu.matmul %6, %7, %cst_5 {dimension_numbers = #tpu.dot_dimension_numbers<[1], [1], [0], [0], [0, 0, 1, 0], [], []>} : vector<16x32xf32>, vector<16x32xf32>, vector<16x16xf32> -> vector<16x16xf32>
    %9 = arith.mulf %6, %6 : vector<16x32xf32>
    %cst_6 = arith.constant dense<0.000000e+00> : vector<16xf32>
    %10 = vector.multi_reduction <add>, %9, %cst_6 [1] : vector<16x32xf32> to vector<16xf32>
    %11 = vector.shape_cast %10 : vector<16xf32> to vector<16x1xf32>
    %cst_7 = arith.constant 5.000000e-01 : f32
    %12 = vector.broadcast %cst_7 : f32 to vector<16x1xf32>
    %13 = arith.mulf %12, %11 : vector<16x1xf32>
    %14 = vector.extract_strided_slice %8 {offsets = [0, 0], sizes = [8, 8], strides = [1, 1]} : vector<16x16xf32> to vector<8x8xf32>
    %15 = vector.extract_strided_slice %13 {offsets = [0, 0], sizes = [8, 1], strides = [1, 1]} : vector<16x1xf32> to vector<8x1xf32>
    %16 = vector.broadcast %15 : vector<8x1xf32> to vector<8x8xf32>
    %17 = arith.subf %14, %16 : vector<8x8xf32>
    %cst_8 = arith.constant 0.176776692 : f32
    %18 = vector.broadcast %cst_8 : f32 to vector<8x8xf32>
    %19 = arith.mulf %17, %18 : vector<8x8xf32>
    %cst_9 = arith.constant dense<0xFF800000> : vector<8xf32>
    %20 = vector.multi_reduction <maximumf>, %19, %cst_9 [0] : vector<8x8xf32> to vector<8xf32>
    %21 = vector.shape_cast %20 : vector<8xf32> to vector<1x8xf32>
    %22 = vector.broadcast %21 : vector<1x8xf32> to vector<8x8xf32>
    %23 = arith.subf %19, %22 : vector<8x8xf32>
    %24 = math.exp %23 : vector<8x8xf32>
    %cst_10 = arith.constant dense<0.000000e+00> : vector<8xf32>
    %25 = vector.multi_reduction <add>, %24, %cst_10 [0] : vector<8x8xf32> to vector<8xf32>
    %26 = vector.shape_cast %25 : vector<8xf32> to vector<1x8xf32>
    %27 = vector.broadcast %26 : vector<1x8xf32> to vector<8x8xf32>
    %28 = arith.divf %24, %27 : vector<8x8xf32>
    %c0_11 = arith.constant 0 : index
    %c0_12 = arith.constant 0 : index
    %29 = vector.load %arg3[%c0_11, %c0_12] : memref<16x8xf32, #tpu.memory_space<vmem>>, vector<8x8xf32>
    tpu.vector_store %arg3[%c0_11, %c0_12], %28 {strides = array<i32>} : memref<16x8xf32, #tpu.memory_space<vmem>>, vector<8x8xf32>,
    %30 = vector.extract_strided_slice %8 {offsets = [8, 8], sizes = [8, 8], strides = [1, 1]} : vector<16x16xf32> to vector<8x8xf32>
    %31 = vector.extract_strided_slice %13 {offsets = [8, 0], sizes = [8, 1], strides = [1, 1]} : vector<16x1xf32> to vector<8x1xf32>
    %32 = vector.broadcast %31 : vector<8x1xf32> to vector<8x8xf32>
    %33 = arith.subf %30, %32 : vector<8x8xf32>
    %cst_13 = arith.constant 0.176776692 : f32
    %34 = vector.broadcast %cst_13 : f32 to vector<8x8xf32>
    %35 = arith.mulf %33, %34 : vector<8x8xf32>
    %cst_14 = arith.constant dense<0xFF800000> : vector<8xf32>
    %36 = vector.multi_reduction <maximumf>, %35, %cst_14 [0] : vector<8x8xf32> to vector<8xf32>
    %37 = vector.shape_cast %36 : vector<8xf32> to vector<1x8xf32>
    %38 = vector.broadcast %37 : vector<1x8xf32> to vector<8x8xf32>
    %39 = arith.subf %35, %38 : vector<8x8xf32>
    %40 = math.exp %39 : vector<8x8xf32>
    %cst_15 = arith.constant dense<0.000000e+00> : vector<8xf32>
    %41 = vector.multi_reduction <add>, %40, %cst_15 [0] : vector<8x8xf32> to vector<8xf32>
    %42 = vector.shape_cast %41 : vector<8xf32> to vector<1x8xf32>
    %43 = vector.broadcast %42 : vector<1x8xf32> to vector<8x8xf32>
    %44 = arith.divf %40, %43 : vector<8x8xf32>
    %c8 = arith.constant 8 : index
    %c0_16 = arith.constant 0 : index
    %45 = vector.load %arg3[%c8, %c0_16] : memref<16x8xf32, #tpu.memory_space<vmem>>, vector<8x8xf32>
    tpu.vector_store %arg3[%c8, %c0_16], %44 {strides = array<i32>} : memref<16x8xf32, #tpu.memory_space<vmem>>, vector<8x8xf32>,
    return
  }
}

</mosaic_0001>

<bundles_post_ra>
// kernel: tpu_custom_call.1
= control target key start
LH: loop header
LB: loop body
LE: loop exit
PB: predicated region body
PF: predicated region fallthrough
CT: control target
= control target key end

     0   :  { %8 = vsyncpa [#allocation3], 0  ;;  %s371_s0 = inlined_call_operand.hbm [shape: f32[32,32], index: 0, kind: input, shape index: {}]   ;;  %s372_s1 = inlined_call_operand.hbm [shape: f32[32,64], index: 1, kind: input, shape index: {}]   ;;  %s373_s2 = inlined_call_operand.vmem [shape: f32[1,64], index: 2, kind: input, shape index: {}]   ;;  %s374_s3 = inlined_call_operand.vmem [shape: f32[16,8], index: 3, kind: output, shape index: {}]  }
   0x1   :  { %s14_s14 = sshll.u32 %s371_s0, 4  ;;  %s15_s14 = int_to_ptr.hbm [resolvable:$true] %s14_s14 }
   0x2   :  { %9 = vsyncpa [#allocation5], 0  ;;  %s314_s15 = smov [#allocation2]   ;;  %s27_s19 = sshll.u32 %s372_s1, 4  ;;  %s28_s19 = int_to_ptr.hbm [resolvable:$true] %s27_s19 }
   0x3   :  { %s16_s16 = sshll.u32 %s314_s15, 4  ;;  %s315_s20 = smov 128   ;;  %s17_s16 = int_to_ptr.vmem [resolvable:$true] %s16_s16 }
   0x4   :  { %s316_s21 = smov 8   ;;  %s317_s22 = smov [#allocation4]  }
   0x5   :  { %22 = dma.hbm_to_vmem [thread:$0]  %s15_s14, 512, %s17_s16, [#allocation3], %s315_s20, %s315_s20, %s316_s21  }
   0x6   :  { %s29_s23 = sshll.u32 %s317_s22, 4  ;;  %s30_s23 = int_to_ptr.vmem [resolvable:$true] %s29_s23 }
   0x7   :  { %35 = dma.hbm_to_vmem [thread:$0]  %s28_s19, 512, %s30_s23, [#allocation5], %s315_s20, %s315_s20, %s316_s21  }
   0x8   :  { %310 = dma.done.wait [#allocation3], 512  }
   0x9   :  { %311 = vsyncadd [#allocation3], 4294966784 }
   0xa   :  { %312 = dma.done.wait [#allocation5], 512  }
   0xb   :  { %313 = vsyncadd [#allocation5], 4294966784  ;;  %v53_v0 = vld [vmem:[#allocation4 + $0x18] sm:$0xff]  ;;  %v52_v1 = vld [vmem:[#allocation4 + $0x10] sm:$0xff]  ;;  %vm58_vm0 = vcmask 261120   ;;  %s318_s24 = smov 96  }
   0xc   :  { %239 = vmatpush.msra.mxu2 %v53_v0  ;;  %240 = vmatpush.msra.mxu3 %v53_v0  ;;  %v51_v2 = vld [vmem:[#allocation4 + $0x8] sm:$0xff]  ;;  %v50_v3 = vld [vmem:[#allocation4] sm:$0xff]  ;;  %v49_v5 = vld [vmem:[#allocation2 + $0x18] sm:$0xff]  ;;  %vm151_vm1 = vcmask 64512   ;;  %vm187_vm2 = vcmask 130112   ;;  %s319_s26 = smov 120  }
   0xd   :  { %83 = vmatpush.msra.mxu0 %v53_v0  ;;  %v47_v4 = vld [vmem:[#allocation2 + $0x8] sm:$0xff]  ;;  %v48_v6 = vld [vmem:[#allocation2 + $0x10] sm:$0xff]  ;;  %v46_v7 = vld [vmem:[#allocation2] sm:$0xff] }
   0xe   :  { %241 = vmatpush.msra.mxu2 %v52_v1  ;;  %242 = vmatpush.msra.mxu3 %v52_v1  ;;  %v253_v8 = vld [vmem:[%s373_s2] ss:$0 sm:$0xff] }
   0xf   :  { %84 = vmatpush.msra.mxu0 %v52_v1 }
  0x10   :  { %243 = vmatpush.msra.mxu2 %v51_v2  ;;  %244 = vmatpush.msra.mxu3 %v51_v2 }
  0x11   :  { %85 = vmatpush.msra.mxu0 %v51_v2 }
  0x12   :  { %245 = vmatpush.msra.mxu2 %v50_v3  ;;  %246 = vmatpush.msra.mxu3 %v50_v3 }
  0x13   :  { %232 = vmatmul.msk.f32.vlgmr.msra.gmra.mxu2 %vm58_vm0, %v47_v4  ;;  %234 = vmatmul.msk.f32.vlgmr.msra.gmra.mxu3 %vm58_vm0, %v49_v5 }
  0x14   :  { %86 = vmatpush.msra.mxu0 %v50_v3 }
  0x15   :  { %231 = vmatmul.msk.f32.vlgmr.msra.gmra.mxu0 %vm58_vm0, %v46_v7 }
  0x1b   :  { %233 = vmatmul.msk.f32.gmra.mxu2 %vm58_vm0, %v48_v6 }
  0x92   :  { %v88_v17 = vpop.f32.mrf.mxu0 }
  0x93   :  { %v89_v18 = vadd.f32 %v253_v8, %v88_v17 }
  0x95   :  { %v139_v19 = vmul.f32 %v89_v18, %v89_v18 }
  0x96   :  { %v91_v9 = vpop.f32.mrf.mxu2  ;;  %v97_v10 = vpop.f32.mrf.mxu3 }
  0x97   :  { %v92_v11 = vadd.f32 %v253_v8, %v91_v9  ;;  %v98_v12 = vadd.f32 %v253_v8, %v97_v10  ;;  %v141_v20 = vsel %vm58_vm0, %v139_v19, 0.0 }
  0x99   :  { %104 = vrot.lane.b32.xlu0 %v98_v12, %s318_s24  ;;  %v140_v13 = vmul.f32 %v92_v11, %v92_v11 }
  0x9b   :  { %v144_v14 = vsel %vm58_vm0, %v140_v13, 0.0 }
  0x9c   :  { %145 = vadd.xlane.f32.xlu1 %v144_v14 }
  0x9e   :  { %v94_v15 = vpop.f32.mrf.mxu2 }
  0x9f   :  { %v95_v16 = vadd.f32 %v253_v8, %v94_v15 }
  0xa1   :  { %102 = vrot.lane.b32.xlu0 %v95_v16, %s318_s24 }
  0xa4   :  { %142 = vadd.xlane.f32.xlu1 %v141_v20 }
 0x10b   :  { %v105_v21 = vpop.permute.xlu0 %104 }
 0x10c   :  { %235 = vmatpush.xpose.msk.msra.mxu1 %vm58_vm0, %v105_v21 }
 0x10f   :  { %v146_v23 = vpop.xlane.xlu1 %145 }
 0x110   :  { %v148_v31 = vmul.f32 0.5, %v146_v23 }
 0x113   :  { %v103_v22 = vpop.permute.xlu0 %102 }
 0x114   :  { %236 = vmatpush.xpose.msk.msra.mxu1 %vm58_vm0, %v103_v22 }
 0x117   :  { %237 = vmatmul.msk.f32.vlgmr.msra.gmra.mxu1 %vm58_vm0, %v89_v18  ;;  %v143_v24 = vpop.xlane.xlu1 %142 }
 0x118   :  { %v147_v25 = vmul.f32 0.5, %v143_v24 }
 0x11f   :  { %238 = vmatmul.msk.f32.gmra.mxu1 %vm58_vm0, %v92_v11 }
 0x194   :  { %v133_v26 = vpop.f32.mrf.mxu1 }
 0x195   :  { %v149_v27 = vsub.f32 %v133_v26, %v147_v25 }
 0x197   :  { %v150_v28 = vmul.f32 0.17677669, %v149_v27 }
 0x199   :  { %v152_v29 = vsel %vm151_vm1, %v150_v28, -inf }
 0x19a   :  { %v153_v30 = vrot.slane %v152_v29, 4 }
 0x19c   :  { %v154_v32 = vmax.f32 %v152_v29, %v153_v30  ;;  %v136_v33 = vpop.f32.mrf.mxu1 }
 0x19d   :  { %v185_v34 = vsub.f32 %v136_v33, %v148_v31 }
 0x19e   :  { %v155_v35 = vrot.slane %v154_v32, 2 }
 0x19f   :  { %v186_v36 = vmul.f32 0.17677669, %v185_v34 }
 0x1a0   :  { %v156_v37 = vmax.f32 %v154_v32, %v155_v35 }
 0x1a1   :  { %v188_v38 = vsel %vm187_vm2, %v186_v36, -inf }
 0x1a2   :  { %v157_v39 = vrot.slane %v156_v37, 1  ;;  %v189_v40 = vrot.slane %v188_v38, 4 }
 0x1a4   :  { %v158_v41 = vmax.f32 %v156_v37, %v157_v39  ;;  %v190_v42 = vmax.f32 %v188_v38, %v189_v40 }
 0x1a6   :  { %v159_v43 = vsub.f32 %v150_v28, %v158_v41  ;;  %v191_v44 = vrot.slane %v190_v42, 2 }
 0x1a8   :  { %v160_v45 = vmul.f32 1.442695, %v159_v43  ;;  %v192_v46 = vmax.f32 %v190_v42, %v191_v44 }
 0x1aa   :  { %254 = vpow2.f32 %v160_v45  ;;  %v193_v47 = vrot.slane %v192_v46, 1 }
 0x1ac   :  { %v194_v48 = vmax.f32 %v192_v46, %v193_v47 }
 0x1ae   :  { %v195_v49 = vsub.f32 %v186_v36, %v194_v48 }
 0x1b0   :  { %v255_v50 = vpop.eup %254  ;;  %v196_v51 = vmul.f32 1.442695, %v195_v49 }
 0x1b1   :  { %v162_v52 = vsel %vm151_vm1, %v255_v50, 0.0 }
 0x1b2   :  { %v163_v53 = vrot.slane %v162_v52, 4  ;;  %256 = vpow2.f32 %v196_v51 }
 0x1b4   :  { %v164_v54 = vadd.f32 %v163_v53, %v162_v52 }
 0x1b6   :  { %v165_v55 = vrot.slane %v164_v54, 2 }
 0x1b8   :  { %v257_v56 = vpop.eup %256  ;;  %v166_v57 = vadd.f32 %v165_v55, %v164_v54 }
 0x1b9   :  { %v198_v58 = vsel %vm187_vm2, %v257_v56, 0.0 }
 0x1ba   :  { %v167_v59 = vrot.slane %v166_v57, 1  ;;  %v199_v60 = vrot.slane %v198_v58, 4 }
 0x1bc   :  { %v168_v61 = vadd.f32 %v167_v59, %v166_v57  ;;  %v200_v62 = vadd.f32 %v199_v60, %v198_v58 }
 0x1be   :  { %258 = vrcp.f32 %v168_v61  ;;  %v201_v63 = vrot.slane %v200_v62, 2  ;;  %v180_v6 = vand.u32 2147483648, %v168_v61  ;;  %v178_v8 = vand.u32 2147483647, %v168_v61 }
 0x1bf   :  { %vm174_vm4 = vweird.f32 %v168_v61 }
 0x1c0   :  { %v202_v0 = vadd.f32 %v201_v63, %v200_v62  ;;  %v181_v10 = vor.u32 1.1754944e-38, %v180_v6  ;;  %vm179_vm6 = vcmp.eq.f32.partialorder %v178_v8, 8.507059e+37 }
 0x1c2   :  { %v203_v1 = vrot.slane %v202_v0, 1 }
 0x1c4   :  { %v259_v2 = vpop.eup %258  ;;  %v204_v4 = vadd.f32 %v203_v1, %v202_v0 }
 0x1c5   :  { %v170_v3 = vmul.f32 %v259_v2, %v168_v61  ;;  %vm175_vm3 = vweird.f32 %v259_v2 }
 0x1c6   :  { %260 = vrcp.f32 %v204_v4  ;;  %vm176_vm5 = vmor %vm174_vm4, %vm175_vm3  ;;  %v216_v17 = vand.u32 2147483648, %v204_v4  ;;  %v214_v19 = vand.u32 2147483647, %v204_v4  ;;  %vm210_vm8 = vweird.f32 %v204_v4 }
 0x1c7   :  { %v171_v5 = vsub.f32 1.0, %v170_v3 }
 0x1c8   :  { %v217_v21 = vor.u32 1.1754944e-38, %v216_v17  ;;  %vm215_vm10 = vcmp.eq.f32.partialorder %v214_v19, 8.507059e+37 }
 0x1c9   :  { %v172_v7 = vmul.f32 %v259_v2, %v171_v5 }
 0x1cb   :  { %v173_v9 = vadd.f32 %v259_v2, %v172_v7 }
 0x1cc   :  { %v261_v11 = vpop.eup %260 }
 0x1cd   :  { %v177_v12 = vsel %vm176_vm5, %v259_v2, %v173_v9  ;;  %v206_v14 = vmul.f32 %v261_v11, %v204_v4  ;;  %vm211_vm7 = vweird.f32 %v261_v11 }
 0x1ce   :  { %v182_v13 = vsel %vm179_vm6, %v181_v10, %v177_v12  ;;  %vm212_vm9 = vmor %vm210_vm8, %vm211_vm7 }
 0x1cf   :  { %v183_v15 = vmul.f32 %v255_v50, %v182_v13  ;;  %v207_v16 = vsub.f32 1.0, %v206_v14 }
 0x1d1   :  { %184 = vst.msk [vmem:[%s374_s3] sm:$0xff] %vm151_vm1, %v183_v15  ;;  %v208_v18 = vmul.f32 %v261_v11, %v207_v16 }
 0x1d3   :  { %v209_v20 = vadd.f32 %v261_v11, %v208_v18 }
 0x1d5   :  { %v213_v22 = vsel %vm212_vm9, %v261_v11, %v209_v20 }
 0x1d6   :  { %v218_v23 = vsel %vm215_vm10, %v217_v21, %v213_v22 }
 0x1d7   :  { %v219_v24 = vmul.f32 %v257_v56, %v218_v23 }
 0x1d9   :  { %221 = vrot.lane.b32.xlu2 %v219_v24, %s319_s26 }
 0x233   :  { %v222_v25 = vpop.permute.xlu2 %221 }
 0x234   :  { %224 = vst.msk [vmem:[%s374_s3 + $0x8] sm:$0xff] %vm151_vm1, %v222_v25 }
 0x235   :  { %229 = vsyncpa [#allocation3], 1 }
 0x236   :  { %230 = vsyncpa [#allocation5], 1 }

</bundles_post_ra>
